<compile_context>
chip_gen: v7x
topology: tpu7x:2x2x1
jax: 0.10.0
libtpu: 0.0.40
codegen_flags: <defaults>
</compile_context>

<pallas_src>
import jax
import jax.numpy as jnp
from jax.experimental import pallas as pl
from jax.experimental.pallas import tpu as pltpu


def _round_up(x, m):
    return ((x + m - 1) // m) * m


def mlp_kernel(x_ref, w1_ref, b1_ref, w2_ref, b2_ref, w3_ref, b3_ref, o_ref):
    # x / weights arrive as bf16 (MXU-native operands); accumulate in f32 on the MXU.
    x = x_ref[...]                                                     # (TILE_B, F) bf16

    h1 = jnp.dot(x, w1_ref[...], preferred_element_type=jnp.float32) + b1_ref[...]
    h1 = jnp.maximum(h1, 0.0)                                          # ReLU, f32 on VPU

    h2 = jnp.dot(h1.astype(jnp.bfloat16), w2_ref[...],
                 preferred_element_type=jnp.float32) + b2_ref[...]
    h2 = 0.5 * (jnp.tanh(0.5 * h2) + 1.0)                              # sigmoid via one EUP tanh

    out = jnp.dot(h2.astype(jnp.bfloat16), w3_ref[...],
                  preferred_element_type=jnp.float32) + b3_ref[...]
    o_ref[...] = out.astype(o_ref.dtype)                               # lane-dense (TILE_B, 128) store


def net_forward(x, params, tile_b=512):
    """Forward pass of Net: Linear(F,50) -> ReLU -> Linear(50,20) -> Sigmoid -> Linear(20,O)."""
    w1, b1, w2, b2, w3, b3 = params
    batch, n_feature = x.shape
    h1_dim = w1.shape[1]
    h2_dim = w2.shape[1]
    n_output = w3.shape[1]

    # --- Lane-dense output: pad the final layer's output width up to 128 lanes (zeros). ---
    n_out_pad = _round_up(max(n_output, 128), 128)
    w3p = jnp.zeros((h2_dim, n_out_pad), jnp.float32).at[:, :n_output].set(w3)
    b3p = jnp.zeros((1, n_out_pad), jnp.float32).at[:, :n_output].set(b3)

    # --- Batch tiling: large row tiles for MXU fill amortization, capped to the (padded) batch. ---
    tile_b = min(tile_b, _round_up(batch, 8))
    batch_p = _round_up(batch, tile_b)
    if batch_p != batch:
        x = jnp.pad(x, ((0, batch_p - batch), (0, 0)))
    grid = (batch_p // tile_b,)

    # --- bf16 MXU operands (f32 accumulation happens inside the kernel); biases stay f32. ---
    x_bf = x.astype(jnp.bfloat16)
    w1_bf = w1.astype(jnp.bfloat16)
    w2_bf = w2.astype(jnp.bfloat16)
    w3_bf = w3p.astype(jnp.bfloat16)

    const = lambda i: (0, 0)  # weights/biases: one VMEM-resident block for the whole grid
    flops = 2 * batch_p * (n_feature * h1_dim + h1_dim * h2_dim + h2_dim * n_out_pad)
    bytes_accessed = (x_bf.size * 2 + w1_bf.size * 2 + w2_bf.size * 2 + w3_bf.size * 2
                      + b1.size * 4 + b2.size * 4 + b3p.size * 4
                      + batch_p * n_out_pad * 4)

    out_padded = pl.pallas_call(
        mlp_kernel,
        out_shape=jax.ShapeDtypeStruct((batch_p, n_out_pad), jnp.float32),
        grid=grid,
        in_specs=[
            pl.BlockSpec((tile_b, n_feature), lambda i: (i, 0)),   # x: tiled over batch
            pl.BlockSpec((n_feature, h1_dim), const),              # w1 (resident)
            pl.BlockSpec((1, h1_dim), const),                      # b1
            pl.BlockSpec((h1_dim, h2_dim), const),                 # w2
            pl.BlockSpec((1, h2_dim), const),                      # b2
            pl.BlockSpec((h2_dim, n_out_pad), const),              # w3 (lane-padded)
            pl.BlockSpec((1, n_out_pad), const),                   # b3 (lane-padded)
        ],
        out_specs=pl.BlockSpec((tile_b, n_out_pad), lambda i: (i, 0)),
        compiler_params=pltpu.CompilerParams(
            dimension_semantics=("parallel",)),                    # v7x: shard batch across 2 TCs
        cost_estimate=pl.CostEstimate(
            flops=flops,
            transcendentals=batch_p * h2_dim,
            bytes_accessed=bytes_accessed),
    )(x_bf, w1_bf, b1, w2_bf, b2, w3_bf, b3p)

    return out_padded[:batch, :n_output]


def init_params(key, n_feature, n_output):
    """Deterministic init mirroring the PyTorch module's layer shapes (stored as (in, out))."""
    k1, k2, k3, k4, k5, k6 = jax.random.split(key, 6)

    def uniform(k, shape, fan_in):
        bound = 1.0 / jnp.sqrt(jnp.float32(fan_in))
        return jax.random.uniform(k, shape, jnp.float32, -bound, bound)

    w1 = uniform(k1, (n_feature, 50), n_feature)
    b1 = uniform(k2, (1, 50), n_feature)
    w2 = uniform(k3, (50, 20), 50)
    b2 = uniform(k4, (1, 20), 50)
    w3 = uniform(k5, (20, n_output), 20)
    b3 = uniform(k6, (1, n_output), 20)
    return (w1, b1, w2, b2, w3, b3)


if __name__ == "__main__":
    n_feature, n_output, batch = 32, 4, 8

    key = jax.random.PRNGKey(0)
    kx, kp = jax.random.split(key)
    x = jax.random.normal(kx, (batch, n_feature), jnp.float32)
    params = init_params(kp, n_feature, n_output)

    out = net_forward(x, params)
    jax.block_until_ready(out)

    # Pure-JAX f32 reference of the same forward pass (kernel uses bf16 MXU operands,
    # so compare with a correspondingly loosened tolerance).
    w1, b1, w2, b2, w3, b3 = params
    h1 = jnp.maximum(x @ w1 + b1, 0.0)
    h2 = jax.nn.sigmoid(h1 @ w2 + b2)
    ref = h2 @ w3 + b3

    assert out.shape == (batch, n_output)
    assert jnp.allclose(out, ref, atol=2e-2, rtol=2e-2), (
        f"max abs err = {jnp.max(jnp.abs(out - ref))}")

    print("KERNEL_OK")
</pallas_src>

<mosaic_0001>
module attributes {stable_mosaic.version = 11 : i64} {
  func.func @mlp_kernel(%arg0: i32, %arg1: memref<8x32xbf16, #tpu.memory_space<vmem>>, %arg2: memref<32x50xbf16, #tpu.memory_space<vmem>>, %arg3: memref<1x50xf32, #tpu.memory_space<vmem>>, %arg4: memref<50x20xbf16, #tpu.memory_space<vmem>>, %arg5: memref<1x20xf32, #tpu.memory_space<vmem>>, %arg6: memref<20x128xbf16, #tpu.memory_space<vmem>>, %arg7: memref<1x128xf32, #tpu.memory_space<vmem>>, %arg8: memref<8x128xf32, #tpu.memory_space<vmem>>) attributes {dimension_semantics = [#tpu.dimension_semantics<parallel>], iteration_bounds = array<i64: 1>, scalar_prefetch = 0 : i64, scratch_operands = 0 : i64, tpu.core_type = #tpu.core_type<tc>, window_params = [{transform_indices = @transform_0, window_bounds = array<i64: 8, 32>}, {pipeline_mode = #tpu.pipeline_mode<synchronous>, transform_indices = @transform_1, window_bounds = array<i64: 32, 50>}, {pipeline_mode = #tpu.pipeline_mode<synchronous>, transform_indices = @transform_2, window_bounds = array<i64: 1, 50>}, {pipeline_mode = #tpu.pipeline_mode<synchronous>, transform_indices = @transform_3, window_bounds = array<i64: 50, 20>}, {pipeline_mode = #tpu.pipeline_mode<synchronous>, transform_indices = @transform_4, window_bounds = array<i64: 1, 20>}, {pipeline_mode = #tpu.pipeline_mode<synchronous>, transform_indices = @transform_5, window_bounds = array<i64: 20, 128>}, {pipeline_mode = #tpu.pipeline_mode<synchronous>, transform_indices = @transform_6, window_bounds = array<i64: 1, 128>}, {transform_indices = @transform_7, window_bounds = array<i64: 8, 128>}]} {
    %c0 = arith.constant 0 : index
    %c0_0 = arith.constant 0 : index
    %0 = vector.load %arg1[%c0, %c0_0] : memref<8x32xbf16, #tpu.memory_space<vmem>>, vector<8x32xbf16>
    %c0_1 = arith.constant 0 : index
    %c0_2 = arith.constant 0 : index
    %1 = vector.load %arg2[%c0_1, %c0_2] : memref<32x50xbf16, #tpu.memory_space<vmem>>, vector<32x50xbf16>
    %cst = arith.constant dense<0.000000e+00> : vector<8x50xf32>
    %2 = tpu.matmul %0, %1, %cst {dimension_numbers = #tpu.dot_dimension_numbers<[1], [0], [0], [1], [0, 0, 1, 1], [], []>} : vector<8x32xbf16>, vector<32x50xbf16>, vector<8x50xf32> -> vector<8x50xf32>
    %c0_3 = arith.constant 0 : index
    %c0_4 = arith.constant 0 : index
    %3 = vector.load %arg3[%c0_3, %c0_4] : memref<1x50xf32, #tpu.memory_space<vmem>>, vector<1x50xf32>
    %4 = vector.broadcast %3 : vector<1x50xf32> to vector<8x50xf32>
    %5 = arith.addf %2, %4 : vector<8x50xf32>
    %cst_5 = arith.constant 0.000000e+00 : f32
    %6 = vector.broadcast %cst_5 : f32 to vector<8x50xf32>
    %7 = arith.maximumf %5, %6 : vector<8x50xf32>
    %8 = arith.truncf %7 : vector<8x50xf32> to vector<8x50xbf16>
    %c0_6 = arith.constant 0 : index
    %c0_7 = arith.constant 0 : index
    %9 = vector.load %arg4[%c0_6, %c0_7] : memref<50x20xbf16, #tpu.memory_space<vmem>>, vector<50x20xbf16>
    %cst_8 = arith.constant dense<0.000000e+00> : vector<8x20xf32>
    %10 = tpu.matmul %8, %9, %cst_8 {dimension_numbers = #tpu.dot_dimension_numbers<[1], [0], [0], [1], [0, 0, 1, 1], [], []>} : vector<8x50xbf16>, vector<50x20xbf16>, vector<8x20xf32> -> vector<8x20xf32>
    %c0_9 = arith.constant 0 : index
    %c0_10 = arith.constant 0 : index
    %11 = vector.load %arg5[%c0_9, %c0_10] : memref<1x20xf32, #tpu.memory_space<vmem>>, vector<1x20xf32>
    %12 = vector.broadcast %11 : vector<1x20xf32> to vector<8x20xf32>
    %13 = arith.addf %10, %12 : vector<8x20xf32>
    %cst_11 = arith.constant 5.000000e-01 : f32
    %14 = vector.broadcast %cst_11 : f32 to vector<8x20xf32>
    %15 = arith.mulf %14, %13 : vector<8x20xf32>
    %16 = math.tanh %15 : vector<8x20xf32>
    %cst_12 = arith.constant 1.000000e+00 : f32
    %17 = vector.broadcast %cst_12 : f32 to vector<8x20xf32>
    %18 = arith.addf %16, %17 : vector<8x20xf32>
    %cst_13 = arith.constant 5.000000e-01 : f32
    %19 = vector.broadcast %cst_13 : f32 to vector<8x20xf32>
    %20 = arith.mulf %19, %18 : vector<8x20xf32>
    %21 = arith.truncf %20 : vector<8x20xf32> to vector<8x20xbf16>
    %c0_14 = arith.constant 0 : index
    %c0_15 = arith.constant 0 : index
    %22 = vector.load %arg6[%c0_14, %c0_15] : memref<20x128xbf16, #tpu.memory_space<vmem>>, vector<20x128xbf16>
    %cst_16 = arith.constant dense<0.000000e+00> : vector<8x128xf32>
    %23 = tpu.matmul %21, %22, %cst_16 {dimension_numbers = #tpu.dot_dimension_numbers<[1], [0], [0], [1], [0, 0, 1, 1], [], []>} : vector<8x20xbf16>, vector<20x128xbf16>, vector<8x128xf32> -> vector<8x128xf32>
    %c0_17 = arith.constant 0 : index
    %c0_18 = arith.constant 0 : index
    %24 = vector.load %arg7[%c0_17, %c0_18] : memref<1x128xf32, #tpu.memory_space<vmem>>, vector<1x128xf32>
    %25 = vector.broadcast %24 : vector<1x128xf32> to vector<8x128xf32>
    %26 = arith.addf %23, %25 : vector<8x128xf32>
    %c0_19 = arith.constant 0 : index
    %c0_20 = arith.constant 0 : index
    %27 = vector.load %arg8[%c0_19, %c0_20] : memref<8x128xf32, #tpu.memory_space<vmem>>, vector<8x128xf32>
    tpu.vector_store %arg8[%c0_19, %c0_20], %26 {strides = array<i32>} : memref<8x128xf32, #tpu.memory_space<vmem>>, vector<8x128xf32>,
    return
  }
  func.func @transform_0(%arg0: i32) -> (i32, i32) {
    %c0_i32 = arith.constant 0 : i32
    %c0_i32_0 = arith.constant 0 : i32
    return %arg0, %c0_i32 : i32, i32
  }
  func.func @transform_1(%arg0: i32) -> (i32, i32) {
    %c0_i32 = arith.constant 0 : i32
    %c0_i32_0 = arith.constant 0 : i32
    %c0_i32_1 = arith.constant 0 : i32
    return %c0_i32, %c0_i32_0 : i32, i32
  }
  func.func @transform_2(%arg0: i32) -> (i32, i32) {
    %c0_i32 = arith.constant 0 : i32
    %c0_i32_0 = arith.constant 0 : i32
    %c0_i32_1 = arith.constant 0 : i32
    return %c0_i32, %c0_i32_0 : i32, i32
  }
  func.func @transform_3(%arg0: i32) -> (i32, i32) {
    %c0_i32 = arith.constant 0 : i32
    %c0_i32_0 = arith.constant 0 : i32
    %c0_i32_1 = arith.constant 0 : i32
    return %c0_i32, %c0_i32_0 : i32, i32
  }
  func.func @transform_4(%arg0: i32) -> (i32, i32) {
    %c0_i32 = arith.constant 0 : i32
    %c0_i32_0 = arith.constant 0 : i32
    %c0_i32_1 = arith.constant 0 : i32
    return %c0_i32, %c0_i32_0 : i32, i32
  }
  func.func @transform_5(%arg0: i32) -> (i32, i32) {
    %c0_i32 = arith.constant 0 : i32
    %c0_i32_0 = arith.constant 0 : i32
    %c0_i32_1 = arith.constant 0 : i32
    return %c0_i32, %c0_i32_0 : i32, i32
  }
  func.func @transform_6(%arg0: i32) -> (i32, i32) {
    %c0_i32 = arith.constant 0 : i32
    %c0_i32_0 = arith.constant 0 : i32
    %c0_i32_1 = arith.constant 0 : i32
    return %c0_i32, %c0_i32_0 : i32, i32
  }
  func.func @transform_7(%arg0: i32) -> (i32, i32) {
    %c0_i32 = arith.constant 0 : i32
    %c0_i32_0 = arith.constant 0 : i32
    return %arg0, %c0_i32 : i32, i32
  }
}

</mosaic_0001>

<bundles_post_ra>
// kernel: tpu_custom_call.1
= control target key start
LH: loop header
LB: loop body
LE: loop exit
PB: predicated region body
PF: predicated region fallthrough
CT: control target
= control target key end

     0   :  { %v358_v1 = vmov 0.0   ;;  %vm359_vm0 = vmmov 0   ;;  %vm52_vm1 = vcmask 261120   ;;  %s452_s0 = inlined_call_operand.vmem [shape: bf16[8,32], index: 0, kind: input, shape index: {}]   ;;  %s453_s1 = inlined_call_operand.vmem [shape: bf16[32,50], index: 1, kind: input, shape index: {}]   ;;  %s454_s2 = inlined_call_operand.vmem [shape: f32[1,50], index: 2, kind: input, shape index: {}]   ;;  %s455_s3 = inlined_call_operand.vmem [shape: bf16[50,20], index: 3, kind: input, shape index: {}]   ;;  %s456_s4 = inlined_call_operand.vmem [shape: f32[1,20], index: 4, kind: input, shape index: {}]   ;;  %s457_s5 = inlined_call_operand.vmem [shape: bf16[20,128], index: 5, kind: input, shape index: {}]   ;;  %s458_s6 = inlined_call_operand.vmem [shape: f32[1,128], index: 6, kind: input, shape index: {}]   ;;  %s459_s7 = inlined_call_operand.hbm [shape: f32[8,128], index: 7, kind: output, shape index: {}]  }
   0x1   :  { %v324_v0 = vld [vmem:[%s453_s1] sm:$0xff]   ;;  %293 = vmatprep.subr.bf16.mxu0 %v358_v1  ;;  %301 = vmatprep.subr.bf16.mxu1 %v358_v1  ;;  %v325_v2 = vld [vmem:[%s453_s1 + $0x8] sm:$0xff]  }
   0x2   :  { %294 = vmatpush3.bf16.msra.mxu0 %v324_v0  ;;  %297 = vmatprep.mubr.msk.bf16.mxu0 %vm359_vm0, %v358_v1  ;;  %v326_v3 = vld [vmem:[%s455_s3] sm:$0xff]   ;;  %v327_v5 = vld [vmem:[%s455_s3 + $0x8] sm:$0xff]  }
   0x3   :  { %295 = vmatprep.subr.bf16.mxu0 %v358_v1  ;;  %309 = vmatprep.mubr.msk.bf16.mxu1 %vm359_vm0, %v358_v1  ;;  %v28_v4 = vld [vmem:[%s452_s0] sm:$0xf] }
   0x4   :  { %302 = vmatpush3.bf16.msra.mxu1 %v326_v3 }
   0x5   :  { %303 = vmatprep.subr.bf16.mxu1 %v358_v1 }
   0x6   :  { %296 = vmatpush3.bf16.msra.mxu0 %v325_v2 }
   0x7   :  { %12 = vsyncpa [#allocation3], 0  ;;  %313 = vmatprep.subr.bf16.mxu0 %v358_v1  ;;  %v328_v6 = vld [vmem:[%s455_s3 + $0x10] sm:$0xff]   ;;  %v329_v7 = vld [vmem:[%s455_s3 + $0x18] ss:$0 sps:$4 sm:$0x11]  }
   0x8   :  { %304 = vmatpush3.bf16.msra.mxu1 %v327_v5  ;;  %vm137_vm2 = vcmask 1040384   ;;  %v268_v9 = vld [vmem:[%s454_s2] ss:$0 sm:$0xff]  ;;  %vm133_vm3 = vcmask 408576   ;;  %vm209_vm4 = vcmask 1041408   ;;  %vm205_vm5 = vcmask 162816  }
   0x9   :  { %298 = vmatmul.mubr.msk.bf16.vlgmr.msra.gmra.mrb[0].mxu0 %vm52_vm1, %v28_v4  ;;  %305 = vmatprep.subr.bf16.mxu1 %v358_v1  ;;  %v139_v8 = vsel %vm137_vm2, %v329_v7, 0  ;;  %v330_v17 = vld [vmem:[%s457_s5] sm:$0xff]   ;;  %v331_v18 = vld [vmem:[%s457_s5 + $0x8] ss:$0 sps:$4 sm:$0x33]   ;;  %s360_s20 = smov [#allocation2]  }
   0xa   :  { %317 = vmatprep.mubr.msk.bf16.mxu0 %vm359_vm0, %v358_v1  ;;  %314 = vmatpush3.bf16.msra.mxu0 %v330_v17  ;;  %v211_v19 = vsel %vm209_vm4, %v331_v18, 0  ;;  %v272_v20 = vld [vmem:[%s456_s4] ss:$0 sm:$0xff]  ;;  %s260_s21 = sshll.u32 %s360_s20, 4  ;;  %s261_s21 = int_to_ptr.vmem [resolvable:$true] %s260_s21 }
   0xb   :  { %315 = vmatprep.subr.bf16.mxu0 %v358_v1  ;;  %v278_v31 = vld [vmem:[%s458_s6] ss:$0 sm:$0xff]  ;;  %s334_s4 = scalar_lea.vmem %s261_s21, 128  ;;  %p339_p1 = scmp.lt.s32.totalorder %s261_s21, %s261_s21 }
   0xc   :  { %306 = vmatpush3.bf16.msra.mxu1 %v328_v6  ;;  %p335_p0 = scmp.ne.s32.totalorder %s261_s21, %s334_s4  ;;  %p340_p2 = scmp.lt.s32.totalorder %s334_s4, %s334_s4 }
   0xd   :  { %307 = vmatprep.subr.bf16.mxu1 %v358_v1 }
   0xe   :  { %316 = vmatpush3.bf16.msra.mxu0 %v211_v19  ;;  %p341_p3 = por %p340_p2, %p339_p1 }
  0x10   :  { %308 = vmatpush3.bf16.msra.mxu1 %v139_v8  ;;  %p342_p4 = pnand %p341_p3, %p335_p0 }
  0xdc   :  { %v90_v10 = vpop.f32.mrb[0].mxu0 }
  0xdd   :  { %v91_v11 = vadd.f32 %v268_v9, %v90_v10  ;;  %v299_v12 = vpop.f32.mrb[1].mxu0 }
  0xde   :  { %v93_v13 = vpop.f32.mrb[2].mxu0 }
  0xdf   :  { %v96_v14 = vmax.f32 %v91_v11, 0.0  ;;  %v300_v15 = vpop.f32.mrb[3].mxu0 }
  0xe1   :  { %v97_v16 = vpack.c.bf16 %v96_v14, %v96_v14 }
  0xe3   :  { %310 = vmatmul.mubr.msk.bf16.vlgmr.msra.gmra.mrb[0].mxu1 %vm133_vm3, %v97_v16 }
 0x1b6   :  { %v175_v21 = vpop.f32.mrb[0].mxu1 }
 0x1b7   :  { %v176_v22 = vadd.f32 %v272_v20, %v175_v21  ;;  %v311_v23 = vpop.f32.mrb[1].mxu1 }
 0x1b8   :  { %v178_v24 = vpop.f32.mrb[2].mxu1 }
 0x1b9   :  { %v181_v25 = vmul.f32 0.5, %v176_v22  ;;  %v312_v26 = vpop.f32.mrb[3].mxu1 }
 0x1bb   :  { %332 = vtanh.f32 %v181_v25 }
 0x1c5   :  { %v333_v27 = vpop.eup %332 }
 0x1c6   :  { %v183_v28 = vadd.f32 1.0, %v333_v27 }
 0x1c8   :  { %v184_v29 = vmul.f32 0.5, %v183_v28 }
 0x1ca   :  { %v185_v30 = vpack.c.bf16 %v184_v29, %v184_v29 }
 0x1cc   :  { %318 = vmatmul.mubr.msk.bf16.vlgmr.msra.gmra.mrb[4].mxu0 %vm205_vm5, %v185_v30 }
 0x29f   :  { %v247_v32 = vpop.f32.mrb[4].mxu0 }
 0x2a0   :  { %v248_v33 = vadd.f32 %v278_v31, %v247_v32  ;;  %v319_v34 = vpop.f32.mrb[5].mxu0 }
 0x2a1   :  { %v250_v35 = vpop.f32.mrb[6].mxu0 }
 0x2a2   :  { %253 = vst [vmem:[#allocation2] sm:$0xff] %v248_v33  ;;  %v320_v36 = vpop.f32.mrb[7].mxu0 }
 0x2a3   :  { %345 = shalt.err (!%p342_p4)
}
 0x2a4   :  { %s346_s6 = scalar_lea.hbm %s459_s7, 128 }
 0x2a5   :  { %p347_p5 = scmp.ne.s32.totalorder %s459_s7, %s346_s6  ;;  %p350_p6 = scmp.lt.u32.totalorder %s346_s6, %s459_s7 }
 0x2a7   :  { %p352_p7 = pnand %p350_p6, %p347_p5 }
 0x2a9   :  { %355 = shalt.err (!%p352_p7)
}
 0x2aa   :  { %263 = dma.vmem_to_hbm [thread:$0]  %s261_s21, 128, %s459_s7, [#allocation3]  }
 0x2ab   :  { %356 = dma.done.wait [#allocation3], 128  }
 0x2ac   :  { %357 = vsyncadd [#allocation3], 4294967168 }
 0x2ad   :  { %267 = vsyncpa [#allocation3], 1 }

</bundles_post_ra>
